<compile_context>
chip_gen: v6e
topology: v6e:2x2x1
jax: 0.10.0
libtpu: 0.0.40
codegen_flags: <defaults>
</compile_context>

<pallas_src>
import functools
from numbers import Number

import jax
import jax.numpy as jnp
from jax.experimental import pallas as pl
from jax.experimental.pallas import tpu as pltpu

_LANE = 128
_SUBLANE = 8
_MAX_BATCH_TILE = 2048  # rows per grid step; VMEM-safe on all generations at these widths


def _round_up(x, m):
    return ((x + m - 1) // m) * m


def _apply_act(h, act, slope):
    if act == "lrelu":
        return jnp.where(h >= 0.0, h, slope * h)
    if act == "xtanh":
        return jnp.tanh(h) + slope * h
    if act == "sigmoid":
        return jax.nn.sigmoid(h)
    if act == "none":
        return h
    raise ValueError(f"Incorrect activation: {act}")


def _pick_tm(n, max_feat):
    """Batch-tile size: big (step-overhead amortization), VMEM-aware, >=2 tiles when possible."""
    # Keep a few f32 slabs of (tm, max_feat) comfortably inside the default scoped VMEM.
    vmem_rows = max(_SUBLANE, (4 << 20) // max(1, 4 * max_feat))
    cap = max(_SUBLANE, min(_MAX_BATCH_TILE, (vmem_rows // _SUBLANE) * _SUBLANE))
    if n <= _SUBLANE:
        return _SUBLANE
    # At least 2 tiles so the "parallel" batch axis can shard across v7x's 2 TensorCores.
    n_tiles = max(2, -(-n // cap))
    tm = _round_up(-(-n // n_tiles), _SUBLANE)
    return min(tm, cap)


# ----------------------------------------------------------------------------
# Fused Pallas kernel: whole MLP for one batch tile.
#   refs = (x_ref, w0_ref, b0_ref, w1_ref, b1_ref, ..., o_ref)
# ----------------------------------------------------------------------------
def _mlp_fused_kernel(*refs, acts, slope, n_layers):
    x_ref = refs[0]
    o_ref = refs[-1]
    params = refs[1:-1]

    h = x_ref[...].astype(jnp.float32)                 # (tm, D_in) f32
    for c in range(n_layers):                          # static unroll (few small layers)
        w = params[2 * c][...]                         # (Din, Dout) bf16, resident
        b = params[2 * c + 1][...]                     # (1, Dout)  f32
        # bf16 MXU operands, f32 accumulation; elementwise stays f32 (v5e-safe).
        h = jnp.dot(h.astype(jnp.bfloat16), w, preferred_element_type=jnp.float32)
        h = h + b
        if c != n_layers - 1:
            h = _apply_act(h, acts[c], slope)
    o_ref[...] = h.astype(o_ref.dtype)


def mlp_forward_fused(x, ws_t_bf16, bs_row, *, acts, slope, tm):
    """x: (N, D_in) f32; ws_t_bf16[c]: (Dc, Dc+1) bf16; bs_row[c]: (1, Dc+1) f32."""
    n, d_in = x.shape
    d_out = ws_t_bf16[-1].shape[1]
    n_layers = len(ws_t_bf16)

    kernel = functools.partial(
        _mlp_fused_kernel, acts=tuple(acts), slope=float(slope), n_layers=n_layers
    )

    # Batch tile of x; weights/biases are resident (same full-array block every step).
    in_specs = [pl.BlockSpec((tm, d_in), lambda i: (i, 0))]
    inputs = [x]
    for w, b in zip(ws_t_bf16, bs_row):
        in_specs.append(pl.BlockSpec(w.shape, lambda i: (0, 0)))
        in_specs.append(pl.BlockSpec(b.shape, lambda i: (0, 0)))
        inputs.append(w)
        inputs.append(b)

    flops = 2 * n * sum(int(w.shape[0]) * int(w.shape[1]) for w in ws_t_bf16)
    transcendentals = 0
    for c in range(n_layers - 1):
        if acts[c] in ("xtanh", "sigmoid"):
            transcendentals += n * int(ws_t_bf16[c].shape[1])
    bytes_accessed = (
        4 * int(x.size)
        + sum(2 * int(w.size) + 4 * int(b.size) for w, b in zip(ws_t_bf16, bs_row))
        + 4 * n * int(d_out)
    )

    return pl.pallas_call(
        kernel,
        out_shape=jax.ShapeDtypeStruct((n, d_out), x.dtype),
        grid=(pl.cdiv(n, tm),),                       # partial last tile is fine: rows independent
        in_specs=in_specs,
        out_specs=pl.BlockSpec((tm, d_out), lambda i: (i, 0)),
        compiler_params=pltpu.CompilerParams(
            dimension_semantics=("parallel",),
        ),
        cost_estimate=pl.CostEstimate(
            flops=flops,
            transcendentals=transcendentals,
            bytes_accessed=bytes_accessed,
        ),
    )(*inputs)


# ----------------------------------------------------------------------------
# MLP wrapper mirroring the PyTorch module's constructor / forward semantics.
# ----------------------------------------------------------------------------
class MLP:
    def __init__(self, input_dim, output_dim, hidden_dim, n_layers,
                 activation="none", slope=0.1, key=None):
        self.input_dim = input_dim
        self.output_dim = output_dim
        self.n_layers = n_layers
        self.slope = slope

        if isinstance(hidden_dim, Number):
            self.hidden_dim = [hidden_dim] * (self.n_layers - 1)
        elif isinstance(hidden_dim, list):
            self.hidden_dim = hidden_dim
        else:
            raise ValueError(f"Wrong argument type for hidden_dim {hidden_dim}")

        if isinstance(activation, str):
            self.activation = [activation] * (self.n_layers - 1)
        elif isinstance(activation, list):
            self.activation = activation
        else:
            raise ValueError(f"Wrong argument type for activation {activation}")
        for act in self.activation:
            if act not in ("lrelu", "xtanh", "sigmoid", "none"):
                raise ValueError(f"Incorrect activation: {act}")

        # Layer sizes exactly as in the PyTorch module.
        if self.n_layers == 1:
            sizes = [(self.input_dim, self.output_dim)]
        else:
            sizes = [(self.input_dim, self.hidden_dim[0])]
            for i in range(1, self.n_layers - 1):
                sizes.append((self.hidden_dim[i - 1], self.hidden_dim[i]))
            sizes.append((self.hidden_dim[self.n_layers - 2], self.output_dim))
        self._sizes = sizes
        self._max_feat = max([sizes[0][0]] + [s[1] for s in sizes])

        # Deterministic init (PyTorch nn.Linear-style uniform(-1/sqrt(fan_in), ...)).
        if key is None:
            key = jax.random.PRNGKey(0)
        self.weights = []   # PyTorch layout (out, in), f32 — kept for the f32 reference check
        self.biases = []
        for (fan_in, fan_out) in sizes:
            key, kw, kb = jax.random.split(key, 3)
            bound = 1.0 / (fan_in ** 0.5)
            w = jax.random.uniform(kw, (fan_out, fan_in), jnp.float32, -bound, bound)
            b = jax.random.uniform(kb, (fan_out,), jnp.float32, -bound, bound)
            self.weights.append(w)
            self.biases.append(b)

        # Pre-transpose ONCE at init and store MXU-ready bf16 weights (no HBM padding).
        self._w_t = [jnp.transpose(w).astype(jnp.bfloat16) for w in self.weights]
        self._b_row = [b.reshape(1, -1).astype(jnp.float32) for b in self.biases]

    def __call__(self, x):
        n = x.shape[0]
        tm = _pick_tm(n, self._max_feat)
        acts = list(self.activation[: self.n_layers - 1]) + ["none"]
        return mlp_forward_fused(
            x, self._w_t, self._b_row, acts=acts, slope=self.slope, tm=tm,
        )


# ----------------------------------------------------------------------------
# References for sanity checks.
# ----------------------------------------------------------------------------
def _ref_forward_f32(mlp, x):
    """Exact module semantics in f32 (for a loose precision-tradeoff check)."""
    h = x
    for c in range(mlp.n_layers):
        h = h @ mlp.weights[c].T + mlp.biases[c]
        if c != mlp.n_layers - 1:
            h = _apply_act(h, mlp.activation[c], mlp.slope)
    return h


def _ref_forward_kernel_numerics(mlp, x):
    """Mimics the kernel's bf16-operand / f32-accumulate numerics (tight check)."""
    h = x.astype(jnp.float32)
    for c in range(mlp.n_layers):
        h = jnp.dot(h.astype(jnp.bfloat16), mlp._w_t[c],
                    preferred_element_type=jnp.float32) + mlp._b_row[c]
        if c != mlp.n_layers - 1:
            h = _apply_act(h, mlp.activation[c], mlp.slope)
    return h


if __name__ == "__main__":
    key = jax.random.PRNGKey(0)
    kx, kx2, kp1, kp2 = jax.random.split(key, 4)

    batch, input_dim, hidden_dim, output_dim, n_layers = 8, 16, 32, 8, 3
    x = jax.random.normal(kx, (batch, input_dim), jnp.float32)

    ok = True

    # Config 1: lrelu activations, tiny batch (single tile).
    mlp1 = MLP(input_dim, output_dim, hidden_dim, n_layers,
               activation="lrelu", slope=0.1, key=kp1)
    out1 = jax.block_until_ready(mlp1(x))
    ok &= out1.shape == (batch, output_dim)
    ok &= bool(jnp.allclose(out1, _ref_forward_kernel_numerics(mlp1, x), atol=1e-4, rtol=1e-4))
    ok &= bool(jnp.allclose(out1, _ref_forward_f32(mlp1, x), atol=5e-2, rtol=5e-2))

    # Config 2: mixed activations (exercises EUP path: tanh / sigmoid).
    mlp2 = MLP(input_dim, output_dim, hidden_dim, n_layers,
               activation=["xtanh", "sigmoid"], slope=0.1, key=kp2)
    out2 = jax.block_until_ready(mlp2(x))
    ok &= out2.shape == (batch, output_dim)
    ok &= bool(jnp.allclose(out2, _ref_forward_kernel_numerics(mlp2, x), atol=1e-4, rtol=1e-4))
    ok &= bool(jnp.allclose(out2, _ref_forward_f32(mlp2, x), atol=5e-2, rtol=5e-2))

    # Config 3: larger batch -> multi-tile grid with a partial last tile.
    x_big = jax.random.normal(kx2, (300, input_dim), jnp.float32)
    out3 = jax.block_until_ready(mlp1(x_big))
    ok &= out3.shape == (300, output_dim)
    ok &= bool(jnp.allclose(out3, _ref_forward_kernel_numerics(mlp1, x_big), atol=1e-4, rtol=1e-4))
    ok &= bool(jnp.allclose(out3, _ref_forward_f32(mlp1, x_big), atol=5e-2, rtol=5e-2))

    assert ok, "mismatch vs reference"
    print("KERNEL_OK")
</pallas_src>

<mosaic_0001>
module attributes {stable_mosaic.version = 11 : i64} {
  func.func @_mlp_fused_kernel(%arg0: i32, %arg1: memref<8x16xf32, #tpu.memory_space<vmem>>, %arg2: memref<16x32xbf16, #tpu.memory_space<vmem>>, %arg3: memref<1x32xf32, #tpu.memory_space<vmem>>, %arg4: memref<32x32xbf16, #tpu.memory_space<vmem>>, %arg5: memref<1x32xf32, #tpu.memory_space<vmem>>, %arg6: memref<32x8xbf16, #tpu.memory_space<vmem>>, %arg7: memref<1x8xf32, #tpu.memory_space<vmem>>, %arg8: memref<8x8xf32, #tpu.memory_space<vmem>>) attributes {dimension_semantics = [#tpu.dimension_semantics<parallel>], iteration_bounds = array<i64: 1>, scalar_prefetch = 0 : i64, scratch_operands = 0 : i64, tpu.core_type = #tpu.core_type<tc>, window_params = [{transform_indices = @transform_0, window_bounds = array<i64: 8, 16>}, {pipeline_mode = #tpu.pipeline_mode<synchronous>, transform_indices = @transform_1, window_bounds = array<i64: 16, 32>}, {pipeline_mode = #tpu.pipeline_mode<synchronous>, transform_indices = @transform_2, window_bounds = array<i64: 1, 32>}, {pipeline_mode = #tpu.pipeline_mode<synchronous>, transform_indices = @transform_3, window_bounds = array<i64: 32, 32>}, {pipeline_mode = #tpu.pipeline_mode<synchronous>, transform_indices = @transform_4, window_bounds = array<i64: 1, 32>}, {pipeline_mode = #tpu.pipeline_mode<synchronous>, transform_indices = @transform_5, window_bounds = array<i64: 32, 8>}, {pipeline_mode = #tpu.pipeline_mode<synchronous>, transform_indices = @transform_6, window_bounds = array<i64: 1, 8>}, {transform_indices = @transform_7, window_bounds = array<i64: 8, 8>}]} {
    %c0 = arith.constant 0 : index
    %c0_0 = arith.constant 0 : index
    %0 = vector.load %arg1[%c0, %c0_0] : memref<8x16xf32, #tpu.memory_space<vmem>>, vector<8x16xf32>
    %c0_1 = arith.constant 0 : index
    %c0_2 = arith.constant 0 : index
    %1 = vector.load %arg2[%c0_1, %c0_2] : memref<16x32xbf16, #tpu.memory_space<vmem>>, vector<16x32xbf16>
    %c0_3 = arith.constant 0 : index
    %c0_4 = arith.constant 0 : index
    %2 = vector.load %arg3[%c0_3, %c0_4] : memref<1x32xf32, #tpu.memory_space<vmem>>, vector<1x32xf32>
    %3 = arith.truncf %0 : vector<8x16xf32> to vector<8x16xbf16>
    %cst = arith.constant dense<0.000000e+00> : vector<8x32xf32>
    %4 = tpu.matmul %3, %1, %cst {dimension_numbers = #tpu.dot_dimension_numbers<[1], [0], [0], [1], [0, 0, 1, 1], [], []>} : vector<8x16xbf16>, vector<16x32xbf16>, vector<8x32xf32> -> vector<8x32xf32>
    %5 = vector.broadcast %2 : vector<1x32xf32> to vector<8x32xf32>
    %6 = arith.addf %4, %5 : vector<8x32xf32>
    %cst_5 = arith.constant 0.000000e+00 : f32
    %7 = vector.broadcast %cst_5 : f32 to vector<8x32xf32>
    %8 = arith.cmpf oge, %6, %7 : vector<8x32xf32>
    %cst_6 = arith.constant 1.000000e-01 : f32
    %9 = vector.broadcast %cst_6 : f32 to vector<8x32xf32>
    %10 = arith.mulf %9, %6 : vector<8x32xf32>
    %11 = arith.select %8, %6, %10 : vector<8x32xi1>, vector<8x32xf32>
    %c0_7 = arith.constant 0 : index
    %c0_8 = arith.constant 0 : index
    %12 = vector.load %arg4[%c0_7, %c0_8] : memref<32x32xbf16, #tpu.memory_space<vmem>>, vector<32x32xbf16>
    %c0_9 = arith.constant 0 : index
    %c0_10 = arith.constant 0 : index
    %13 = vector.load %arg5[%c0_9, %c0_10] : memref<1x32xf32, #tpu.memory_space<vmem>>, vector<1x32xf32>
    %14 = arith.truncf %11 : vector<8x32xf32> to vector<8x32xbf16>
    %cst_11 = arith.constant dense<0.000000e+00> : vector<8x32xf32>
    %15 = tpu.matmul %14, %12, %cst_11 {dimension_numbers = #tpu.dot_dimension_numbers<[1], [0], [0], [1], [0, 0, 1, 1], [], []>} : vector<8x32xbf16>, vector<32x32xbf16>, vector<8x32xf32> -> vector<8x32xf32>
    %16 = vector.broadcast %13 : vector<1x32xf32> to vector<8x32xf32>
    %17 = arith.addf %15, %16 : vector<8x32xf32>
    %cst_12 = arith.constant 0.000000e+00 : f32
    %18 = vector.broadcast %cst_12 : f32 to vector<8x32xf32>
    %19 = arith.cmpf oge, %17, %18 : vector<8x32xf32>
    %cst_13 = arith.constant 1.000000e-01 : f32
    %20 = vector.broadcast %cst_13 : f32 to vector<8x32xf32>
    %21 = arith.mulf %20, %17 : vector<8x32xf32>
    %22 = arith.select %19, %17, %21 : vector<8x32xi1>, vector<8x32xf32>
    %c0_14 = arith.constant 0 : index
    %c0_15 = arith.constant 0 : index
    %23 = vector.load %arg6[%c0_14, %c0_15] : memref<32x8xbf16, #tpu.memory_space<vmem>>, vector<32x8xbf16>
    %c0_16 = arith.constant 0 : index
    %c0_17 = arith.constant 0 : index
    %24 = vector.load %arg7[%c0_16, %c0_17] : memref<1x8xf32, #tpu.memory_space<vmem>>, vector<1x8xf32>
    %25 = arith.truncf %22 : vector<8x32xf32> to vector<8x32xbf16>
    %cst_18 = arith.constant dense<0.000000e+00> : vector<8x8xf32>
    %26 = tpu.matmul %25, %23, %cst_18 {dimension_numbers = #tpu.dot_dimension_numbers<[1], [0], [0], [1], [0, 0, 1, 1], [], []>} : vector<8x32xbf16>, vector<32x8xbf16>, vector<8x8xf32> -> vector<8x8xf32>
    %27 = vector.broadcast %24 : vector<1x8xf32> to vector<8x8xf32>
    %28 = arith.addf %26, %27 : vector<8x8xf32>
    %c0_19 = arith.constant 0 : index
    %c0_20 = arith.constant 0 : index
    %29 = vector.load %arg8[%c0_19, %c0_20] : memref<8x8xf32, #tpu.memory_space<vmem>>, vector<8x8xf32>
    tpu.vector_store %arg8[%c0_19, %c0_20], %28 {strides = array<i32>} : memref<8x8xf32, #tpu.memory_space<vmem>>, vector<8x8xf32>,
    return
  }
  func.func @transform_0(%arg0: i32) -> (i32, i32) {
    %c0_i32 = arith.constant 0 : i32
    %c0_i32_0 = arith.constant 0 : i32
    return %arg0, %c0_i32 : i32, i32
  }
  func.func @transform_1(%arg0: i32) -> (i32, i32) {
    %c0_i32 = arith.constant 0 : i32
    %c0_i32_0 = arith.constant 0 : i32
    %c0_i32_1 = arith.constant 0 : i32
    return %c0_i32, %c0_i32_0 : i32, i32
  }
  func.func @transform_2(%arg0: i32) -> (i32, i32) {
    %c0_i32 = arith.constant 0 : i32
    %c0_i32_0 = arith.constant 0 : i32
    %c0_i32_1 = arith.constant 0 : i32
    return %c0_i32, %c0_i32_0 : i32, i32
  }
  func.func @transform_3(%arg0: i32) -> (i32, i32) {
    %c0_i32 = arith.constant 0 : i32
    %c0_i32_0 = arith.constant 0 : i32
    %c0_i32_1 = arith.constant 0 : i32
    return %c0_i32, %c0_i32_0 : i32, i32
  }
  func.func @transform_4(%arg0: i32) -> (i32, i32) {
    %c0_i32 = arith.constant 0 : i32
    %c0_i32_0 = arith.constant 0 : i32
    %c0_i32_1 = arith.constant 0 : i32
    return %c0_i32, %c0_i32_0 : i32, i32
  }
  func.func @transform_5(%arg0: i32) -> (i32, i32) {
    %c0_i32 = arith.constant 0 : i32
    %c0_i32_0 = arith.constant 0 : i32
    %c0_i32_1 = arith.constant 0 : i32
    return %c0_i32, %c0_i32_0 : i32, i32
  }
  func.func @transform_6(%arg0: i32) -> (i32, i32) {
    %c0_i32 = arith.constant 0 : i32
    %c0_i32_0 = arith.constant 0 : i32
    %c0_i32_1 = arith.constant 0 : i32
    return %c0_i32, %c0_i32_0 : i32, i32
  }
  func.func @transform_7(%arg0: i32) -> (i32, i32) {
    %c0_i32 = arith.constant 0 : i32
    %c0_i32_0 = arith.constant 0 : i32
    return %arg0, %c0_i32 : i32, i32
  }
}

</mosaic_0001>

<bundles_post_ra>
// kernel: tpu_custom_call.1
= control target key start
LH: loop header
LB: loop body
LE: loop exit
PB: predicated region body
PF: predicated region fallthrough
CT: control target
= control target key end

     0   :  { %12 = vsyncpa [#allocation3], 0  ;;  %s472_s0 = inlined_call_operand.vmem [shape: f32[8,16], index: 0, kind: input, shape index: {}]   ;;  %s473_s1 = inlined_call_operand.hbm [shape: bf16[16,32], index: 1, kind: input, shape index: {}]   ;;  %s474_s2 = inlined_call_operand.vmem [shape: f32[1,32], index: 2, kind: input, shape index: {}]   ;;  %s475_s3 = inlined_call_operand.vmem [shape: bf16[32,32], index: 3, kind: input, shape index: {}]   ;;  %s476_s4 = inlined_call_operand.hbm [shape: f32[1,32], index: 4, kind: input, shape index: {}]   ;;  %s477_s5 = inlined_call_operand.vmem [shape: bf16[32,8], index: 5, kind: input, shape index: {}]   ;;  %s478_s6 = inlined_call_operand.vmem [shape: f32[1,8], index: 6, kind: input, shape index: {}]   ;;  %s479_s7 = inlined_call_operand.hbm [shape: f32[8,8], index: 7, kind: output, shape index: {}]  }
   0x1   :  { %13 = vsyncpa [#allocation6], 0 }
   0x2   :  { %14 = vsyncpa [#allocation4], 0  ;;  %s393_s24 = smov [#allocation2]  }
   0x3   :  { %s22_s25 = sshll.u32 %s393_s24, 4  ;;  %s23_s25 = int_to_ptr.vmem [resolvable:$true] %s22_s25 }
   0x4   :  { %s335_s26 = scalar_lea.vmem %s23_s25, 128  ;;  %p340_p1 = scmp.lt.s32.totalorder %s23_s25, %s23_s25 }
   0x5   :  { %p336_p0 = scmp.ne.s32.totalorder %s23_s25, %s335_s26  ;;  %p341_p2 = scmp.lt.s32.totalorder %s335_s26, %s335_s26 }
   0x7   :  { %p342_p3 = por %p341_p2, %p340_p1 }
   0x9   :  { %p343_p4 = pnand %p342_p3, %p336_p0 }
   0xb   :  { %346 = shalt.err (!%p343_p4)
}
   0xc   :  { %s394_s27 = smov 64   ;;  %s395_s28 = smov 4  }
   0xd   :  { %28 = dma.hbm_to_vmem [thread:$0]  %s473_s1, 128, %s23_s25, [#allocation3], %s394_s27, %s394_s27, %s395_s28  }
   0xe   :  { %s396_s8 = smov [#allocation5]  }
   0xf   :  { %s39_s9 = sshll.u32 %s396_s8, 4  ;;  %s40_s9 = int_to_ptr.vmem [resolvable:$true] %s39_s9 }
  0x10   :  { %s355_s10 = scalar_lea.vmem %s40_s9, 16  ;;  %s359_s11 = scalar_lea.vmem %s40_s9, 32 }
  0x11   :  { %p356_p5 = scmp.ne.s32.totalorder %s40_s9, %s355_s10  ;;  %p360_p6 = scmp.lt.s32.totalorder %s40_s9, %s40_s9 }
  0x12   :  { %p361_p7 = scmp.lt.s32.totalorder %s359_s11, %s355_s10 }
  0x14   :  { %p362_p8 = por %p361_p7, %p360_p6 }
  0x16   :  { %p363_p9 = pnand %p362_p8, %p356_p5 }
  0x18   :  { %366 = shalt.err (!%p363_p9)
}
  0x19   :  { %42 = dma.hbm_to_vmem [thread:$0]  %s476_s4, 16, %s40_s9, [#allocation6]  }
  0x1a   :  { %387 = dma.done.wait [#allocation3], 128  }
  0x1b   :  { %388 = vsyncadd [#allocation3], 4294967168 }
  0x1c   :  { %389 = dma.done.wait [#allocation6], 16  }
  0x1d   :  { %390 = vsyncadd [#allocation6], 4294967280  ;;  %v397_v0 = vmov 0.0   ;;  %vm398_vm0 = vmmov 0   ;;  %v322_v1 = vld [vmem:[#allocation2] sm:$0xff]   ;;  %vm71_vm1 = vcmask 130048  }
  0x1e   :  { %293 = vmatprep.subr.bf16.mxu0 %v397_v0  ;;  %295 = vmatprep.mubr.msk.bf16.mxu0 %vm398_vm0, %v397_v0  ;;  %v54_v2 = vld [vmem:[%s472_s0] sm:$0xff]  ;;  %v323_v4 = vld [vmem:[%s475_s3 + $0x8] sm:$0xff]   ;;  %vm142_vm3 = vcmask 261120   ;;  %s399_s23 = smov [#allocation7]   ;;  %vm256_vm5 = vcmask 64512  }
  0x1f   :  { %299 = vmatprep.subr.bf16.mxu1 %v397_v0  ;;  %303 = vmatprep.mubr.msk.bf16.mxu1 %vm398_vm0, %v397_v0  ;;  %v58_v3 = vpack.c.bf16 %v54_v2, %v54_v2  ;;  %v324_v5 = vld [vmem:[%s475_s3] sm:$0xff]   ;;  %v325_v15 = vld [vmem:[%s477_s5 + $0x8] sm:$0xff]   ;;  %s264_s24 = sshll.u32 %s399_s23, 4  ;;  %s265_s24 = int_to_ptr.vmem [resolvable:$true] %s264_s24 }
  0x20   :  { %294 = vmatpush3.bf16.msra.mxu0 %v322_v1  ;;  %300 = vmatpush3.bf16.msra.mxu1 %v323_v4  ;;  %v274_v6 = vld [vmem:[%s474_s2] ss:$0 sm:$0xff]  ;;  %v277_v17 = vld [vmem:[#allocation5] ss:$0 sm:$0xff]  ;;  %p372_p11 = scmp.lt.s32.totalorder %s265_s24, %s265_s24 }
  0x21   :  { %307 = vmatprep.subr.bf16.mxu0 %v397_v0  ;;  %301 = vmatprep.subr.bf16.mxu1 %v397_v0  ;;  %v326_v16 = vld [vmem:[%s477_s5] sm:$0xff]   ;;  %s367_s5 = scalar_lea.vmem %s265_s24, 128 }
  0x22   :  { %v281_v26 = vld [vmem:[%s478_s6] ss:$0 sm:$0xff]  ;;  %p368_p10 = scmp.ne.s32.totalorder %s265_s24, %s367_s5  ;;  %p373_p12 = scmp.lt.s32.totalorder %s367_s5, %s367_s5 }
  0x23   :  { %296 = vmatmul.mubr.msk.bf16.vlgmr.msra.gmra.mxu0 %vm71_vm1, %v58_v3 }
  0x24   :  { %311 = vmatprep.mubr.msk.bf16.mxu0 %vm398_vm0, %v397_v0  ;;  %302 = vmatpush3.bf16.msra.mxu1 %v324_v5  ;;  %p374_p13 = por %p373_p12, %p372_p11 }
  0x25   :  { %308 = vmatpush3.bf16.msra.mxu0 %v325_v15 }
  0x26   :  { %309 = vmatprep.subr.bf16.mxu0 %v397_v0  ;;  %p375_p0 = pnand %p374_p13, %p368_p10 }
  0x29   :  { %310 = vmatpush3.bf16.msra.mxu0 %v326_v16 }
  0xe3   :  { %v109_v7 = vpop.f32.mrf.mxu0 }
  0xe4   :  { %v110_v8 = vadd.f32 %v274_v6, %v109_v7 }
  0xe5   :  { %v297_v9 = vpop.f32.mrf.mxu0 }
  0xe6   :  { %vm115_vm2 = vcmp.ge.f32.partialorder %v110_v8, 0.0  ;;  %v116_v10 = vmul.f32 0.1, %v110_v8 }
  0xe7   :  { %v112_v11 = vpop.f32.mrf.mxu0 }
  0xe8   :  { %v117_v12 = vsel %vm115_vm2, %v110_v8, %v116_v10 }
  0xe9   :  { %v123_v13 = vpack.c.bf16 %v117_v12, %v117_v12  ;;  %v298_v14 = vpop.f32.mrf.mxu0 }
  0xeb   :  { %304 = vmatmul.mubr.msk.bf16.vlgmr.msra.gmra.mxu1 %vm142_vm3, %v123_v13 }
 0x1ab   :  { %v180_v18 = vpop.f32.mrf.mxu1 }
 0x1ac   :  { %v181_v19 = vadd.f32 %v277_v17, %v180_v18 }
 0x1ad   :  { %v305_v20 = vpop.f32.mrf.mxu1 }
 0x1ae   :  { %vm186_vm4 = vcmp.ge.f32.partialorder %v181_v19, 0.0  ;;  %v187_v21 = vmul.f32 0.1, %v181_v19 }
 0x1af   :  { %v183_v22 = vpop.f32.mrf.mxu1 }
 0x1b0   :  { %v188_v23 = vsel %vm186_vm4, %v181_v19, %v187_v21 }
 0x1b1   :  { %v194_v24 = vpack.c.bf16 %v188_v23, %v188_v23  ;;  %v306_v25 = vpop.f32.mrf.mxu1 }
 0x1b3   :  { %312 = vmatmul.mubr.msk.bf16.vlgmr.msra.gmra.mxu0 %vm142_vm3, %v194_v24 }
 0x273   :  { %v250_v27 = vpop.f32.mrf.mxu0 }
 0x274   :  { %v251_v28 = vadd.f32 %v281_v26, %v250_v27 }
 0x275   :  { %v313_v29 = vpop.f32.mrf.mxu0 }
 0x276   :  { %257 = vst.msk [vmem:[#allocation7] sm:$0xff] %vm256_vm5, %v251_v28 }
 0x277   :  { %v253_v30 = vpop.f32.mrf.mxu0 }
 0x278   :  { %378 = shalt.err (!%p375_p0)
}
 0x279   :  { %267 = dma.vmem_to_hbm [thread:$0]  %s265_s24, 128, %s479_s7, [#allocation4]   ;;  %v314_v31 = vpop.f32.mrf.mxu0 }
 0x27a   :  { %391 = dma.done.wait [#allocation4], 128  }
 0x27b   :  { %392 = vsyncadd [#allocation4], 4294967168 }
 0x27c   :  { %271 = vsyncpa [#allocation3], 1 }
 0x27d   :  { %272 = vsyncpa [#allocation6], 1 }
 0x27e   :  { %273 = vsyncpa [#allocation4], 1 }

</bundles_post_ra>
